<compile_context>
chip_gen: v7x
topology: tpu7x:2x2x1
jax: 0.10.0
libtpu: 0.0.40
codegen_flags: <defaults>
</compile_context>

<pallas_src>
import functools

import jax
import jax.numpy as jnp
from jax.experimental import pallas as pl
from jax.experimental.pallas import tpu as pltpu


def _cdiv(a, b):
    return -(-a // b)


def _round_up(n, m):
    return ((n + m - 1) // m) * m


def _num_tensorcores():
    """Best-effort TensorCores-per-chip (v7x: 2, v5e/v6e: 1). Conservative fallback = 1."""
    try:
        info = pltpu.get_tpu_info()
        for attr in ("num_cores", "num_tensorcores", "tensorcores_per_chip", "cores_per_chip"):
            v = getattr(info, attr, None)
            if isinstance(v, int) and v > 0:
                return v
    except Exception:
        pass
    try:
        kind = jax.devices()[0].device_kind.lower()
        if "v7" in kind or "7x" in kind:
            return 2
    except Exception:
        pass
    return 1


def _mlp_kernel(x_ref, w0T_ref, b0_ref, w1T_ref, b1_ref, w2_ref, b2_ref, o_ref,
                *, compute_dtype):
    """Whole MLP forward for one batch tile, fully in VMEM.

    x tile arrives batch-major (bt, F) float32 straight from HBM; it is reoriented and cast
    in-kernel (XLU transpose + VPU cast ride otherwise-idle slots, no extra HBM round trip).
    The network then runs transposed: h^T = W^T @ x^T with batch on the lane axis.
    """
    xT = jnp.transpose(x_ref[...])                       # (F, bt) f32 — in-kernel XLU transpose
    xT = xT.astype(compute_dtype)                        # in-kernel cast (not in the XLA wrapper)

    # Layer 0: Linear + ReLU (Dropout == identity in eval mode). MXU, f32 accumulate.
    h = jnp.dot(w0T_ref[...], xT, preferred_element_type=jnp.float32)    # (H0, bt) f32
    h = jnp.maximum(h + b0_ref[...], 0.0)                                # bias/ReLU in f32

    # Layer 1: Linear + ReLU (Dropout == identity in eval mode).
    h = jnp.dot(w1T_ref[...], h.astype(compute_dtype),
                preferred_element_type=jnp.float32)                      # (H1, bt) f32
    h = jnp.maximum(h + b1_ref[...], 0.0)

    # Output head (out_features=1): VPU broadcast-multiply + XLU sublane reduce instead of an
    # Nx1 MXU matmul.  Result (1, bt) is lane-dense -> unmasked stores.
    out = jnp.sum(h * w2_ref[...], axis=0, keepdims=True) + b2_ref[...]  # (1, bt) f32
    o_ref[...] = out.astype(o_ref.dtype)


def _full_spec(shape):
    # Constant-index full-array block: DMA'd once, stays resident in VMEM across grid steps.
    return pl.BlockSpec(shape, lambda i: tuple(0 for _ in shape))


def interest_predictor_forward(x, params, *, batch_tile=4096, use_bf16=True):
    """x: [B, input_features] float32 -> [B, 1] float32.

    use_bf16=True is the fast path (bf16-native MXU on v5e/v6e/v7x); use_bf16=False is an
    accuracy/debug path.
    """
    (w0, b0), (w1, b1), (w2, b2) = params      # w stored as [in, out] (PyTorch weight.T)
    B, F = x.shape
    H0 = w0.shape[1]
    H1 = w1.shape[1]
    compute_dtype = jnp.bfloat16 if use_bf16 else jnp.float32

    # ---- batch tile: large, multiple of 128, never larger than the (128-aligned) batch ----
    bt = max(128, (min(int(batch_tile), _round_up(B, 128)) // 128) * 128)

    # Only on multi-TensorCore chips (v7x / megacore): keep >= n_cores grid steps so the
    # "parallel" batch axis shards across cores.  Single-TC parts keep one big resident tile.
    n_cores = _num_tensorcores()
    if n_cores > 1 and _cdiv(B, bt) < n_cores:
        bt = max(128, _round_up(_cdiv(B, n_cores), 128))

    # Minimal padding: only for tiny unaligned batches (<= 127 extra rows) so block dims never
    # exceed array dims.  Large batches are never copied; ragged tails use Pallas edge masking.
    B_pad = max(B, bt)
    x_in = x if B_pad == B else jnp.pad(x, ((0, B_pad - B), (0, 0)))
    grid = (_cdiv(B_pad, bt),)

    # ---- tiny weight/bias prep (a few KB; negligible XLA work) ----
    w0T = w0.T.astype(compute_dtype)                     # (H0, F)
    w1T = w1.T.astype(compute_dtype)                     # (H1, H0)
    b0c = b0.reshape(H0, 1).astype(jnp.float32)          # broadcast along lanes
    b1c = b1.reshape(H1, 1).astype(jnp.float32)
    w2c = w2.reshape(H1, 1).astype(jnp.float32)          # head kept in f32 (VPU/XLU path)
    b2c = b2.reshape(1, 1).astype(jnp.float32)

    out = pl.pallas_call(
        functools.partial(_mlp_kernel, compute_dtype=compute_dtype),
        out_shape=jax.ShapeDtypeStruct((1, B_pad), jnp.float32),
        grid_spec=pltpu.PrefetchScalarGridSpec(
            num_scalar_prefetch=0,
            grid=grid,
            in_specs=[
                pl.BlockSpec((bt, F), lambda i: (i, 0)),   # x tile: the only streamed input
                _full_spec((H0, F)), _full_spec((H0, 1)),  # layer 0
                _full_spec((H1, H0)), _full_spec((H1, 1)),  # layer 1
                _full_spec((H1, 1)), _full_spec((1, 1)),   # output head
            ],
            out_specs=pl.BlockSpec((1, bt), lambda i: (0, i)),   # lane-dense output slab
            # If tiles must stay small (tiny-batch deployments), pipeline_mode=pl.Buffered(3)
            # on the x spec can hide DMA issue latency; unnecessary at the default tile size.
        ),
        compiler_params=pltpu.CompilerParams(
            dimension_semantics=("parallel",),
        ),
    )(x_in, w0T, b0c, w1T, b1c, w2c, b2c)

    return out[0, :B].reshape(B, 1)


def init_params(key, input_features, neurons_per_layer):
    """Deterministic synthetic init mirroring the PyTorch module's shapes.

    PyTorch nn.Linear(in, out) has weight [out, in]; we store the transpose [in, out].
    """
    dims = [input_features] + list(neurons_per_layer) + [1]
    params = []
    for i in range(len(dims) - 1):
        key, kw, kb = jax.random.split(key, 3)
        fan_in = dims[i]
        scale = 1.0 / jnp.sqrt(jnp.float32(fan_in))
        w = jax.random.uniform(kw, (dims[i], dims[i + 1]), jnp.float32, -scale, scale)
        b = jax.random.uniform(kb, (1, dims[i + 1]), jnp.float32, -scale, scale)
        params.append((w, b))
    return params


def reference_forward(x, params, *, compute_dtype=jnp.float32):
    """Pure-JAX reference (eval-mode dropout == identity), matching kernel dtypes."""
    (w0, b0), (w1, b1), (w2, b2) = params
    cd = compute_dtype
    h = jnp.dot(x.astype(cd), w0.astype(cd), preferred_element_type=jnp.float32) + b0
    h = jnp.maximum(h, 0.0)
    h = jnp.dot(h.astype(cd), w1.astype(cd), preferred_element_type=jnp.float32) + b1
    h = jnp.maximum(h, 0.0)
    return jnp.dot(h, w2.astype(jnp.float32)) + b2        # head in f32, like the kernel


if __name__ == "__main__":
    key = jax.random.PRNGKey(0)

    # Shapes consistent with the module:
    #   input_features=32, neurons_per_layer=[64, 32], dropout_rate=0.5 (eval -> identity)
    input_features = 32
    neurons_per_layer = [64, 32]

    key, kp = jax.random.split(key)
    params = init_params(kp, input_features, neurons_per_layer)

    # Cases: tiny batch (single padded tile), exact tile fit, and a multi-step ragged grid.
    for B, tile in ((16, 4096), (512, 4096), (1000, 256)):
        key, kx = jax.random.split(key)
        x = jax.random.normal(kx, (B, input_features), jnp.float32)

        # bf16-streamed kernel vs matching-dtype reference.
        out = interest_predictor_forward(x, params, batch_tile=tile, use_bf16=True)
        out = jax.block_until_ready(out)
        assert out.shape == (B, 1)
        ref_bf16 = reference_forward(x, params, compute_dtype=jnp.bfloat16)
        assert jnp.allclose(out, ref_bf16, atol=2e-3, rtol=2e-3), "mismatch vs bf16 reference"

        # Sanity vs full-f32 reference (loose: bf16 rounding of x / weights / activations).
        ref_f32 = reference_forward(x, params, compute_dtype=jnp.float32)
        assert jnp.allclose(out, ref_f32, atol=1e-1, rtol=1e-1), "mismatch vs f32 reference (loose)"

        # f32 kernel path vs f32 reference.
        out_f32 = interest_predictor_forward(x, params, batch_tile=tile, use_bf16=False)
        out_f32 = jax.block_until_ready(out_f32)
        assert jnp.allclose(out_f32, ref_f32, atol=1e-3, rtol=1e-3), "mismatch vs f32 reference"

    print("KERNEL_OK")
</pallas_src>

<mosaic_0001>
module attributes {stable_mosaic.version = 11 : i64} {
  func.func @_mlp_kernel(%arg0: i32, %arg1: memref<128x32xf32, #tpu.memory_space<vmem>>, %arg2: memref<64x32xbf16, #tpu.memory_space<vmem>>, %arg3: memref<64x1xf32, #tpu.memory_space<vmem>>, %arg4: memref<32x64xbf16, #tpu.memory_space<vmem>>, %arg5: memref<32x1xf32, #tpu.memory_space<vmem>>, %arg6: memref<32x1xf32, #tpu.memory_space<vmem>>, %arg7: memref<1x1xf32, #tpu.memory_space<vmem>>, %arg8: memref<1x128xf32, #tpu.memory_space<vmem>>) attributes {dimension_semantics = [#tpu.dimension_semantics<parallel>], iteration_bounds = array<i64: 1>, scalar_prefetch = 0 : i64, scratch_operands = 0 : i64, tpu.core_type = #tpu.core_type<tc>, window_params = [{transform_indices = @transform_0, window_bounds = array<i64: 128, 32>}, {pipeline_mode = #tpu.pipeline_mode<synchronous>, transform_indices = @transform_1, window_bounds = array<i64: 64, 32>}, {pipeline_mode = #tpu.pipeline_mode<synchronous>, transform_indices = @transform_2, window_bounds = array<i64: 64, 1>}, {pipeline_mode = #tpu.pipeline_mode<synchronous>, transform_indices = @transform_3, window_bounds = array<i64: 32, 64>}, {pipeline_mode = #tpu.pipeline_mode<synchronous>, transform_indices = @transform_4, window_bounds = array<i64: 32, 1>}, {pipeline_mode = #tpu.pipeline_mode<synchronous>, transform_indices = @transform_5, window_bounds = array<i64: 32, 1>}, {pipeline_mode = #tpu.pipeline_mode<synchronous>, transform_indices = @transform_6, window_bounds = array<i64: 1, 1>}, {transform_indices = @transform_7, window_bounds = array<i64: 1, 128>}]} {
    %c0 = arith.constant 0 : index
    %c0_0 = arith.constant 0 : index
    %0 = vector.load %arg1[%c0, %c0_0] : memref<128x32xf32, #tpu.memory_space<vmem>>, vector<128x32xf32>
    %1 = tpu.transpose %0, [1, 0] : vector<128x32xf32> -> vector<32x128xf32>
    %2 = arith.truncf %1 : vector<32x128xf32> to vector<32x128xbf16>
    %c0_1 = arith.constant 0 : index
    %c0_2 = arith.constant 0 : index
    %3 = vector.load %arg2[%c0_1, %c0_2] : memref<64x32xbf16, #tpu.memory_space<vmem>>, vector<64x32xbf16>
    %cst = arith.constant dense<0.000000e+00> : vector<64x128xf32>
    %4 = tpu.matmul %3, %2, %cst {dimension_numbers = #tpu.dot_dimension_numbers<[1], [0], [0], [1], [0, 0, 1, 1], [], []>} : vector<64x32xbf16>, vector<32x128xbf16>, vector<64x128xf32> -> vector<64x128xf32>
    %c0_3 = arith.constant 0 : index
    %c0_4 = arith.constant 0 : index
    %5 = vector.load %arg3[%c0_3, %c0_4] : memref<64x1xf32, #tpu.memory_space<vmem>>, vector<64x1xf32>
    %6 = vector.broadcast %5 : vector<64x1xf32> to vector<64x128xf32>
    %7 = arith.addf %4, %6 : vector<64x128xf32>
    %cst_5 = arith.constant 0.000000e+00 : f32
    %8 = vector.broadcast %cst_5 : f32 to vector<64x128xf32>
    %9 = arith.maximumf %7, %8 : vector<64x128xf32>
    %c0_6 = arith.constant 0 : index
    %c0_7 = arith.constant 0 : index
    %10 = vector.load %arg4[%c0_6, %c0_7] : memref<32x64xbf16, #tpu.memory_space<vmem>>, vector<32x64xbf16>
    %11 = arith.truncf %9 : vector<64x128xf32> to vector<64x128xbf16>
    %cst_8 = arith.constant dense<0.000000e+00> : vector<32x128xf32>
    %12 = tpu.matmul %10, %11, %cst_8 {dimension_numbers = #tpu.dot_dimension_numbers<[1], [0], [0], [1], [0, 0, 1, 1], [], []>} : vector<32x64xbf16>, vector<64x128xbf16>, vector<32x128xf32> -> vector<32x128xf32>
    %c0_9 = arith.constant 0 : index
    %c0_10 = arith.constant 0 : index
    %13 = vector.load %arg5[%c0_9, %c0_10] : memref<32x1xf32, #tpu.memory_space<vmem>>, vector<32x1xf32>
    %14 = vector.broadcast %13 : vector<32x1xf32> to vector<32x128xf32>
    %15 = arith.addf %12, %14 : vector<32x128xf32>
    %cst_11 = arith.constant 0.000000e+00 : f32
    %16 = vector.broadcast %cst_11 : f32 to vector<32x128xf32>
    %17 = arith.maximumf %15, %16 : vector<32x128xf32>
    %c0_12 = arith.constant 0 : index
    %c0_13 = arith.constant 0 : index
    %18 = vector.load %arg6[%c0_12, %c0_13] : memref<32x1xf32, #tpu.memory_space<vmem>>, vector<32x1xf32>
    %19 = vector.broadcast %18 : vector<32x1xf32> to vector<32x128xf32>
    %20 = arith.mulf %17, %19 : vector<32x128xf32>
    %cst_14 = arith.constant dense<0.000000e+00> : vector<128xf32>
    %21 = vector.multi_reduction <add>, %20, %cst_14 [0] : vector<32x128xf32> to vector<128xf32>
    %22 = vector.shape_cast %21 : vector<128xf32> to vector<1x128xf32>
    %c0_15 = arith.constant 0 : index
    %c0_16 = arith.constant 0 : index
    %23 = vector.load %arg7[%c0_15, %c0_16] : memref<1x1xf32, #tpu.memory_space<vmem>>, vector<1x1xf32>
    %24 = vector.broadcast %23 : vector<1x1xf32> to vector<1x128xf32>
    %25 = arith.addf %22, %24 : vector<1x128xf32>
    %c0_17 = arith.constant 0 : index
    %c0_18 = arith.constant 0 : index
    %26 = vector.load %arg8[%c0_17, %c0_18] : memref<1x128xf32, #tpu.memory_space<vmem>>, vector<1x128xf32>
    tpu.vector_store %arg8[%c0_17, %c0_18], %25 {strides = array<i32>} : memref<1x128xf32, #tpu.memory_space<vmem>>, vector<1x128xf32>,
    return
  }
  func.func @transform_0(%arg0: i32) -> (i32, i32) {
    %c0_i32 = arith.constant 0 : i32
    %c0_i32_0 = arith.constant 0 : i32
    return %arg0, %c0_i32 : i32, i32
  }
  func.func @transform_1(%arg0: i32) -> (i32, i32) {
    %c0_i32 = arith.constant 0 : i32
    %c0_i32_0 = arith.constant 0 : i32
    %c0_i32_1 = arith.constant 0 : i32
    return %c0_i32, %c0_i32_0 : i32, i32
  }
  func.func @transform_2(%arg0: i32) -> (i32, i32) {
    %c0_i32 = arith.constant 0 : i32
    %c0_i32_0 = arith.constant 0 : i32
    %c0_i32_1 = arith.constant 0 : i32
    return %c0_i32, %c0_i32_0 : i32, i32
  }
  func.func @transform_3(%arg0: i32) -> (i32, i32) {
    %c0_i32 = arith.constant 0 : i32
    %c0_i32_0 = arith.constant 0 : i32
    %c0_i32_1 = arith.constant 0 : i32
    return %c0_i32, %c0_i32_0 : i32, i32
  }
  func.func @transform_4(%arg0: i32) -> (i32, i32) {
    %c0_i32 = arith.constant 0 : i32
    %c0_i32_0 = arith.constant 0 : i32
    %c0_i32_1 = arith.constant 0 : i32
    return %c0_i32, %c0_i32_0 : i32, i32
  }
  func.func @transform_5(%arg0: i32) -> (i32, i32) {
    %c0_i32 = arith.constant 0 : i32
    %c0_i32_0 = arith.constant 0 : i32
    %c0_i32_1 = arith.constant 0 : i32
    return %c0_i32, %c0_i32_0 : i32, i32
  }
  func.func @transform_6(%arg0: i32) -> (i32, i32) {
    %c0_i32 = arith.constant 0 : i32
    %c0_i32_0 = arith.constant 0 : i32
    %c0_i32_1 = arith.constant 0 : i32
    return %c0_i32, %c0_i32_0 : i32, i32
  }
  func.func @transform_7(%arg0: i32) -> (i32, i32) {
    %c0_i32 = arith.constant 0 : i32
    %c0_i32_0 = arith.constant 0 : i32
    return %c0_i32, %arg0 : i32, i32
  }
}

</mosaic_0001>

<bundles_post_ra>
// kernel: tpu_custom_call.1
= control target key start
LH: loop header
LB: loop body
LE: loop exit
PB: predicated region body
PF: predicated region fallthrough
CT: control target
= control target key end

     0   :  { %s666_s0 = inlined_call_operand.vmem [shape: f32[128,32], index: 0, kind: input, shape index: {}]   ;;  %s667_s1 = inlined_call_operand.vmem [shape: bf16[64,32], index: 1, kind: input, shape index: {}]   ;;  %s668_s2 = inlined_call_operand.vmem [shape: f32[64,1], index: 2, kind: input, shape index: {}]   ;;  %s669_s3 = inlined_call_operand.vmem [shape: bf16[32,64], index: 3, kind: input, shape index: {}]   ;;  %s670_s4 = inlined_call_operand.vmem [shape: f32[32,1], index: 4, kind: input, shape index: {}]   ;;  %s671_s5 = inlined_call_operand.vmem [shape: f32[32,1], index: 5, kind: input, shape index: {}]   ;;  %s672_s6 = inlined_call_operand.<no memory space> [shape: f32[1,1], index: 6, kind: input, shape index: {}]   ;;  %s673_s7 = inlined_call_operand.hbm [shape: f32[1,128], index: 7, kind: output, shape index: {}]  }
   0x1   :  { %v12_v0 = vstv %s672_s6 }
   0x2   :  { %13 = vst [vmem:[#allocation2] sm:$0x1] %v12_v0 }
   0x3   :  { %v30_v1 = vld [vmem:[%s666_s0] sm:$0xff]  ;;  %v31_v2 = vld [vmem:[%s666_s0 + $0x8] sm:$0xff]  ;;  %v32_v3 = vld [vmem:[%s666_s0 + $0x10] sm:$0xff] }
   0x4   :  { %46 = vxpose.xlu0.b32.start [1/16] (narrow) %v30_v1, 32 }
   0x8   :  { %47 = vxpose.xlu0.b32.cont [2/16] (narrow) %v31_v2, 32 }
   0xc   :  { %48 = vxpose.xlu0.b32.cont [3/16] (narrow) %v32_v3, 32 }
   0xd   :  { %14 = vsyncpa [#allocation4], 0  ;;  %v33_v4 = vld [vmem:[%s666_s0 + $0x18] sm:$0xff]  ;;  %v34_v5 = vld [vmem:[%s666_s0 + $0x20] sm:$0xff]  ;;  %vm156_vm0 = vcmask 261120   ;;  %v489_v11 = vmov 0  }
   0xe   :  { %v459_v6 = vld [vmem:[%s667_s1] sm:$0xff]   ;;  %v35_v7 = vld [vmem:[%s666_s0 + $0x28] sm:$0xff]  ;;  %v36_v8 = vld [vmem:[%s666_s0 + $0x30] sm:$0xff]  ;;  %457 = vset.pattern.permute.xlu1 %v489_v11  ;;  %vm284_vm1 = vcmask 523264  }
   0xf   :  { %435 = vmatprep.mubr.msk.bf16.mxu0 %vm156_vm0, %v459_v6  ;;  %v37_v9 = vld [vmem:[%s666_s0 + $0x38] sm:$0xff]  ;;  %v88_v10 = vld [vmem:[%s668_s2] sm:$0xff]  ;;  %v89_v13 = vld [vmem:[%s668_s2 + $0x8] sm:$0xff] }
  0x10   :  { %49 = vxpose.xlu0.b32.cont [4/16] (narrow) %v33_v4, 32  ;;  %v38_v12 = vld [vmem:[%s666_s0 + $0x40] sm:$0xff]  ;;  %98 = vperm.xlu1 %457, %v88_v10   ;;  %v39_v14 = vld [vmem:[%s666_s0 + $0x48] sm:$0xff]  ;;  %v90_v15 = vld [vmem:[%s668_s2 + $0x10] sm:$0xff] }
  0x11   :  { %v40_v16 = vld [vmem:[%s666_s0 + $0x50] sm:$0xff]  ;;  %v91_v17 = vld [vmem:[%s668_s2 + $0x18] sm:$0xff]  ;;  %v92_v19 = vld [vmem:[%s668_s2 + $0x20] sm:$0xff] }
  0x12   :  { %v41_v18 = vld [vmem:[%s666_s0 + $0x58] sm:$0xff]  ;;  %v42_v20 = vld [vmem:[%s666_s0 + $0x60] sm:$0xff]  ;;  %v93_v21 = vld [vmem:[%s668_s2 + $0x28] sm:$0xff] }
  0x13   :  { %v43_v22 = vld [vmem:[%s666_s0 + $0x68] sm:$0xff]  ;;  %v94_v23 = vld [vmem:[%s668_s2 + $0x30] sm:$0xff]  ;;  %v95_v25 = vld [vmem:[%s668_s2 + $0x38] sm:$0xff] }
  0x14   :  { %50 = vxpose.xlu0.b32.cont [5/16] (narrow) %v34_v5, 32  ;;  %103 = vperm.xlu1 %457, %v89_v13   ;;  %v44_v24 = vld [vmem:[%s666_s0 + $0x70] sm:$0xff]  ;;  %v45_v26 = vld [vmem:[%s666_s0 + $0x78] sm:$0xff]  ;;  %v250_v27 = vld [vmem:[%s670_s4] sm:$0xff] }
  0x15   :  { %v251_v28 = vld [vmem:[%s670_s4 + $0x8] sm:$0xff]  ;;  %v252_v29 = vld [vmem:[%s670_s4 + $0x10] sm:$0xff]  ;;  %v253_v30 = vld [vmem:[%s670_s4 + $0x18] sm:$0xff] }
  0x16   :  { %v344_v31 = vld [vmem:[%s671_s5] sm:$0xff]  ;;  %v345_v32 = vld [vmem:[%s671_s5 + $0x8] sm:$0xff]  ;;  %v346_v33 = vld [vmem:[%s671_s5 + $0x10] sm:$0xff] }
  0x17   :  { %v347_v34 = vld [vmem:[%s671_s5 + $0x18] sm:$0xff]  ;;  %v460_v41 = vld [vmem:[%s667_s1 + $0x8] sm:$0xff]   ;;  %v461_v42 = vld [vmem:[%s667_s1 + $0x10] sm:$0xff]  }
  0x18   :  { %51 = vxpose.xlu0.b32.cont [6/16] (narrow) %v35_v7, 32  ;;  %108 = vperm.xlu1 %457, %v90_v15   ;;  %v462_v43 = vld [vmem:[%s667_s1 + $0x18] sm:$0xff]   ;;  %v463_v44 = vld [vmem:[%s669_s3] sm:$0xff]  }
  0x19   :  { %451 = vmatprep.mubr.msk.bf16.mxu1 %vm284_vm1, %v463_v44  ;;  %v381_v45 = vld [vmem:[#allocation2] sm:$0x1] }
  0x1c   :  { %52 = vxpose.xlu0.b32.cont [7/16] (narrow) %v36_v8, 32  ;;  %113 = vperm.xlu1 %457, %v91_v17  }
  0x20   :  { %53 = vxpose.xlu0.b32.cont [8/16] (narrow) %v37_v9, 32  ;;  %118 = vperm.xlu1 %457, %v92_v19  }
  0x24   :  { %54 = vxpose.xlu0.b32.cont [9/16] (narrow) %v38_v12, 32  ;;  %123 = vperm.xlu1 %457, %v93_v21  }
  0x28   :  { %55 = vxpose.xlu0.b32.cont [10/16] (narrow) %v39_v14, 32  ;;  %128 = vperm.xlu1 %457, %v94_v23  }
  0x2c   :  { %56 = vxpose.xlu0.b32.cont [11/16] (narrow) %v40_v16, 32  ;;  %133 = vperm.xlu1 %457, %v95_v25  }
  0x30   :  { %57 = vxpose.xlu0.b32.cont [12/16] (narrow) %v41_v18, 32  ;;  %256 = vperm.xlu1 %457, %v250_v27   ;;  %v464_v18 = vld [vmem:[%s669_s3 + $0x8] sm:$0xff]   ;;  %s490_s3 = smov [#allocation3]  }
  0x31   :  { %s399_s25 = sshll.u32 %s490_s3, 4  ;;  %s400_s25 = int_to_ptr.vmem [resolvable:$true] %s399_s25 }
  0x32   :  { %s465_s26 = scalar_lea.vmem %s400_s25, 16  ;;  %s469_s27 = scalar_lea.vmem %s400_s25, 32 }
  0x33   :  { %p466_p0 = scmp.ne.s32.totalorder %s400_s25, %s465_s26  ;;  %p470_p1 = scmp.lt.s32.totalorder %s400_s25, %s400_s25 }
  0x34   :  { %58 = vxpose.xlu0.b32.cont [13/16] (narrow) %v42_v20, 32  ;;  %261 = vperm.xlu1 %457, %v251_v28   ;;  %p471_p2 = scmp.lt.s32.totalorder %s469_s27, %s465_s26 }
  0x36   :  { %p472_p3 = por %p471_p2, %p470_p1 }
  0x38   :  { %59 = vxpose.xlu0.b32.cont [14/16] (narrow) %v43_v22, 32  ;;  %266 = vperm.xlu1 %457, %v252_v29   ;;  %p473_p4 = pnand %p472_p3, %p466_p0 }
  0x3c   :  { %60 = vxpose.xlu0.b32.cont [15/16] (narrow) %v44_v24, 32  ;;  %271 = vperm.xlu1 %457, %v253_v30  }
  0x40   :  { %61 = vxpose.xlu0.b32.end [16/16] (narrow) %v45_v26, 32  ;;  %350 = vperm.xlu1 %457, %v344_v31  }
  0x44   :  { %355 = vperm.xlu1 %457, %v345_v32  }
  0x48   :  { %360 = vperm.xlu1 %457, %v346_v33  }
  0x4c   :  { %365 = vperm.xlu1 %457, %v347_v34  }
  0x69   :  { %458 = vset.pattern.permute.xlu0 %v489_v11 }
  0x6a   :  { %384 = vperm.xlu0 %458, %v381_v45   ;;  %v387_v45 = vlaneseq }
  0x84   :  { %v62_v35 = vpop.trf.xlu0 }
  0x88   :  { %v63_v36 = vpop.trf.xlu0 }
  0x89   :  { %v78_v37 = vpack.c.bf16 %v63_v36, %v62_v35 }
  0x8b   :  { %431 = vmatprep.subr.bf16.mxu0 %v78_v37 }
  0x8c   :  { %432 = vmatpush3.bf16.msra.mxu0 %v78_v37  ;;  %v64_v38 = vpop.trf.xlu0 }
  0x8f   :  { %v99_v46 = vpop.permute.xlu1 %98 }
  0x90   :  { %v65_v39 = vpop.trf.xlu0 }
  0x91   :  { %v79_v40 = vpack.c.bf16 %v65_v39, %v64_v38 }
  0x93   :  { %433 = vmatprep.subr.bf16.mxu0 %v79_v40  ;;  %v104_v47 = vpop.permute.xlu1 %103 }
  0x94   :  { %434 = vmatpush3.bf16.msra.mxu0 %v79_v40 }
  0x97   :  { %436 = vmatmul.mubr.msk.bf16.vlgmr.msra.gmra.mrb[0].mxu0 %vm156_vm0, %v460_v41  ;;  %v109_v48 = vpop.permute.xlu1 %108 }
  0x98   :  { %439 = vmatprep.mubr.msk.bf16.mxu0 %vm156_vm0, %v461_v42 }
  0x9b   :  { %v114_v49 = vpop.permute.xlu1 %113 }
  0x9f   :  { %440 = vmatmul.mubr.msk.bf16.gmra.mrb[4].mxu0 %vm156_vm0, %v462_v43  ;;  %v119_v50 = vpop.permute.xlu1 %118 }
  0xa3   :  { %v124_v51 = vpop.permute.xlu1 %123 }
  0xa7   :  { %v129_v59 = vpop.permute.xlu1 %128 }
  0xab   :  { %v134_v6 = vpop.permute.xlu1 %133 }
  0xaf   :  { %v257_v19 = vpop.permute.xlu1 %256 }
  0xb3   :  { %v262_v20 = vpop.permute.xlu1 %261 }
  0xb7   :  { %v267_v21 = vpop.permute.xlu1 %266 }
  0xbb   :  { %v272_v22 = vpop.permute.xlu1 %271 }
  0xbf   :  { %v351_v23 = vpop.permute.xlu1 %350 }
  0xc3   :  { %v356_v24 = vpop.permute.xlu1 %355 }
  0xc7   :  { %v361_v34 = vpop.permute.xlu1 %360 }
  0xcb   :  { %v366_v42 = vpop.permute.xlu1 %365 }
 0x16a   :  { %v437_v52 = vpop.f32.mrb[0].mxu0 }
 0x16b   :  { %v212_v53 = vadd.f32 %v437_v52, %v109_v48  ;;  %v203_v54 = vpop.f32.mrb[1].mxu0  ;;  %v385_v52 = vpop.permute.xlu0 %384 }
 0x16c   :  { %v204_v55 = vadd.f32 %v203_v54, %v99_v46  ;;  %v438_v56 = vpop.f32.mrb[2].mxu0 }
 0x16d   :  { %v215_v57 = vadd.f32 %v438_v56, %v114_v49  ;;  %v206_v58 = vpop.f32.mrb[3].mxu0  ;;  %v236_v61 = vmax.f32 %v212_v53, 0.0 }
 0x16e   :  { %v207_v60 = vadd.f32 %v206_v58, %v104_v47  ;;  %v234_v63 = vmax.f32 %v204_v55, 0.0  ;;  %v388_v47 = vshrl.u32 %v387_v45, 7 }
 0x16f   :  { %v237_v62 = vmax.f32 %v215_v57, 0.0 }
 0x170   :  { %v235_v0 = vmax.f32 %v207_v60, 0.0 }
 0x171   :  { %v247_v1 = vpack.c.bf16 %v237_v62, %v236_v61 }
 0x172   :  { %v441_v2 = vpop.f32.mrb[4].mxu0  ;;  %v246_v3 = vpack.c.bf16 %v235_v0, %v234_v63 }
 0x173   :  { %v228_v4 = vadd.f32 %v441_v2, %v129_v59  ;;  %v219_v5 = vpop.f32.mrb[5].mxu0 }
 0x174   :  { %v220_v7 = vadd.f32 %v219_v5, %v119_v50  ;;  %v442_v8 = vpop.f32.mrb[6].mxu0  ;;  %443 = vmatprep.subr.bf16.mxu1 %v246_v3  ;;  %v389_v50 = vsub.s32 0, %v388_v47 }
 0x175   :  { %v231_v9 = vadd.f32 %v442_v8, %v134_v6  ;;  %v222_v10 = vpop.f32.mrb[7].mxu0  ;;  %444 = vmatpush3.bf16.msra.mxu1 %v246_v3  ;;  %v240_v12 = vmax.f32 %v228_v4, 0.0 }
 0x176   :  { %v223_v11 = vadd.f32 %v222_v10, %v124_v51  ;;  %445 = vmatprep.subr.bf16.mxu1 %v247_v1  ;;  %v238_v14 = vmax.f32 %v220_v7, 0.0  ;;  %v390_v54 = vrot.slane %v385_v52, %v389_v50 }
 0x177   :  { %v241_v13 = vmax.f32 %v231_v9, 0.0 }
 0x178   :  { %v239_v15 = vmax.f32 %v223_v11, 0.0 }
 0x179   :  { %v249_v16 = vpack.c.bf16 %v241_v13, %v240_v12  ;;  %446 = vmatpush3.bf16.msra.mxu1 %v247_v1 }
 0x17a   :  { %v248_v17 = vpack.c.bf16 %v239_v15, %v238_v14 }
 0x17c   :  { %447 = vmatprep.subr.bf16.mxu1 %v248_v17 }
 0x17d   :  { %448 = vmatpush3.bf16.msra.mxu1 %v248_v17 }
 0x17e   :  { %449 = vmatprep.subr.bf16.mxu1 %v249_v16 }
 0x181   :  { %450 = vmatpush3.bf16.msra.mxu1 %v249_v16 }
 0x184   :  { %452 = vmatmul.mubr.msk.bf16.vlgmr.msra.gmra.mrb[0].mxu1 %vm284_vm1, %v464_v18 }
 0x257   :  { %v453_v25 = vpop.f32.mrb[0].mxu1 }
 0x258   :  { %v325_v26 = vpop.f32.mrb[1].mxu1  ;;  %v334_v27 = vadd.f32 %v453_v25, %v267_v21 }
 0x259   :  { %v326_v28 = vadd.f32 %v325_v26, %v257_v19  ;;  %v454_v29 = vpop.f32.mrb[2].mxu1 }
 0x25a   :  { %v328_v30 = vpop.f32.mrb[3].mxu1  ;;  %v337_v32 = vadd.f32 %v454_v29, %v272_v22  ;;  %v342_v35 = vmax.f32 %v334_v27, 0.0 }
 0x25b   :  { %v340_v31 = vmax.f32 %v326_v28, 0.0  ;;  %v329_v33 = vadd.f32 %v328_v30, %v262_v20 }
 0x25c   :  { %v343_v38 = vmax.f32 %v337_v32, 0.0  ;;  %v370_v40 = vmul.f32 %v361_v34, %v342_v35 }
 0x25d   :  { %v341_v36 = vmax.f32 %v329_v33, 0.0  ;;  %v368_v37 = vmul.f32 %v351_v23, %v340_v31 }
 0x25e   :  { %v371_v43 = vmul.f32 %v366_v42, %v343_v38 }
 0x25f   :  { %v369_v39 = vmul.f32 %v356_v24, %v341_v36 }
 0x261   :  { %v372_v41 = vadd.f32 %v369_v39, %v368_v37 }
 0x263   :  { %v373_v44 = vadd.f32 %v372_v41, %v370_v40 }
 0x265   :  { %v374_v46 = vadd.f32 %v373_v44, %v371_v43 }
 0x267   :  { %v375_v48 = vrot.slane %v374_v46, 4 }
 0x269   :  { %v376_v49 = vadd.f32 %v375_v48, %v374_v46 }
 0x26b   :  { %v377_v51 = vrot.slane %v376_v49, 2 }
 0x26d   :  { %v378_v53 = vadd.f32 %v377_v51, %v376_v49 }
 0x26f   :  { %v379_v55 = vrot.slane %v378_v53, 1 }
 0x271   :  { %v380_v56 = vadd.f32 %v379_v55, %v378_v53 }
 0x273   :  { %v391_v57 = vadd.f32 %v390_v54, %v380_v56 }
 0x275   :  { %392 = vst [vmem:[#allocation3] sm:$0x1] %v391_v57 }
 0x276   :  { %476 = shalt.err (!%p473_p4)
}
 0x277   :  { %s477_s30 = scalar_lea.hbm %s673_s7, 16 }
 0x278   :  { %p478_p5 = scmp.ne.s32.totalorder %s673_s7, %s477_s30  ;;  %p481_p6 = scmp.lt.u32.totalorder %s477_s30, %s673_s7 }
 0x27a   :  { %p483_p7 = pnand %p481_p6, %p478_p5 }
 0x27c   :  { %486 = shalt.err (!%p483_p7)
}
 0x27d   :  { %402 = dma.vmem_to_hbm [thread:$0]  %s400_s25, 16, %s673_s7, [#allocation4]  }
 0x27e   :  { %487 = dma.done.wait [#allocation4], 16  }
 0x27f   :  { %488 = vsyncadd [#allocation4], 4294967280 }
 0x280   :  { %406 = vsyncpa [#allocation4], 1 }

</bundles_post_ra>
